<compile_context>
chip_gen: v5e
topology: v5e:2x2
jax: 0.10.0
libtpu: 0.0.40
codegen_flags: <defaults>
</compile_context>

<pallas_src>
import math

import jax
import jax.numpy as jnp
from jax import lax
from jax.experimental import pallas as pl
from jax.experimental.pallas import tpu as pltpu

EPS_NORM = 1e-6   # RMSNorm eps (norm1 / norm2)
EPS_LA = 1e-15    # LiteLA denominator eps


def _rmsnorm(x):
    # matches diffusers RMSNorm(elementwise_affine=False): x * rsqrt(mean(x^2) + eps)
    var = jnp.mean(x * x, axis=-1, keepdims=True)
    return x * lax.rsqrt(var + EPS_NORM)


def _silu(x):
    return x * jax.nn.sigmoid(x)


def _make_block_kernel(S, D, H):
    """Builds the fused per-batch kernel. One grid step == one batch element."""

    def kernel(x_ref, mod_ref, hm_ref,
               wqkv_ref, bqkv_ref, wo_ref, bo_ref,
               wi_ref, bi_ref, wd_ref, bd_ref, wp_ref,
               out_ref):
        x = x_ref[0]          # (S, D) f32
        mod = mod_ref[0]      # (6, D): shift_msa, scale_msa, gate_msa, shift_mlp, scale_mlp, gate_mlp
        shift_msa, scale_msa, gate_msa = mod[0:1], mod[1:2], mod[2:3]
        shift_mlp, scale_mlp, gate_mlp = mod[3:4], mod[4:5], mod[5:6]
        hm = hm_ref[...]      # (D, D) block-diagonal same-head mask (0/1, f32)

        # ---------------- norm1 + adaLN-single modulation (f32) ----------------
        nx = _rmsnorm(x) * (1.0 + scale_msa) + shift_msa
        nx_b = nx.astype(jnp.bfloat16)

        # ---------------- fused QKV projection (bf16 MXU, f32 accumulation) ----------------
        qkv = jnp.dot(nx_b, wqkv_ref[...], preferred_element_type=jnp.float32) + bqkv_ref[...]
        q = jnp.maximum(qkv[:, :D], 0.0)          # ReLU kernel feature map
        k = jnp.maximum(qkv[:, D:2 * D], 0.0)
        v = qkv[:, 2 * D:]

        # ---------------- LiteLA linear attention via block-diagonal head mask (f32) ----------------
        # kv[e, i] = sum_s k[s, e] * v[s, i]; cross-head blocks are zeroed by the mask so the
        # single lane-dense (S,D)x(D,D) matmul below reproduces the per-head q @ (k^T v).
        kv = lax.dot_general(k, v, (((0,), (0,)), ((), ())),
                             preferred_element_type=jnp.float32) * hm            # (D, D)
        num = jnp.dot(q, kv, preferred_element_type=jnp.float32)                  # (S, D)
        ksum = jnp.sum(k, axis=0, keepdims=True)                                   # (1, D)
        # den[s, i] = sum_{e in head(i)} q[s, e] * ksum[e]  == torch "pad value row" denominator
        den = jnp.dot(q * ksum, hm, preferred_element_type=jnp.float32)            # (S, D), f32
        attn = num * pl.reciprocal(den + EPS_LA, approx=True)                      # (S, D)

        attn = jnp.dot(attn.astype(jnp.bfloat16), wo_ref[...],
                       preferred_element_type=jnp.float32) + bo_ref[...]
        h1 = x + gate_msa * attn                                                   # residual (f32)

        # ---------------- norm2 + adaLN-single modulation ----------------
        n2 = _rmsnorm(h1) * (1.0 + scale_mlp) + shift_mlp

        # ---------------- GLUMBConv feed-forward ----------------
        # inverted_conv: 1x1 conv (== matmul) + SiLU
        u = _silu(jnp.dot(n2.astype(jnp.bfloat16), wi_ref[...],
                          preferred_element_type=jnp.float32) + bi_ref[...])       # (S, 2H) f32
        # depth_conv: depthwise k=3, pad=1 along sequence (no activation).
        # Shifted rows via XLU rolls + boundary masks (no concat / unaligned slices).
        wd = wd_ref[...]                                                           # (3, 2H)
        row = lax.broadcasted_iota(jnp.int32, (S, 2 * H), 0)
        u_prev = jnp.where(row == 0, 0.0, pltpu.roll(u, 1, 0))                     # u[s-1], 0 at s=0
        u_next = jnp.where(row == S - 1, 0.0, pltpu.roll(u, S - 1, 0))             # u[s+1], 0 at s=S-1
        y = u_prev * wd[0:1] + u * wd[1:2] + u_next * wd[2:3] + bd_ref[...]        # (S, 2H)
        # GLU gate: first H channels = main, second H channels = gate (torch.chunk on channel dim)
        a = y[:, :H]
        g = y[:, H:]
        z = a * _silu(g)
        # point_conv: 1x1 conv, no bias, no activation
        ff = jnp.dot(z.astype(jnp.bfloat16), wp_ref[...],
                     preferred_element_type=jnp.float32)                           # (S, D)

        out_ref[0] = h1 + gate_mlp * ff

    return kernel


def linear_transformer_block(x, mod, params, *, num_heads):
    """x: (B, S, D) float32; mod: (B, 6, D) = scale_shift_table[None] + temb.reshape(B,6,D)."""
    B, S, D = x.shape
    head_dim = D // num_heads
    assert num_heads * head_dim == D
    H = params["wp"].shape[0]           # hidden_features of GLUMBConv

    # Fuse Q/K/V into one projection; cast matmul weights to bf16 (f32 accumulation in-kernel).
    wqkv = jnp.concatenate([params["wq"], params["wk"], params["wv"]], axis=1).astype(jnp.bfloat16)
    bqkv = jnp.concatenate([params["bq"], params["bk"], params["bv"]], axis=1).astype(jnp.float32)
    wo = params["wo"].astype(jnp.bfloat16)
    wi = params["wi"].astype(jnp.bfloat16)
    wp = params["wp"].astype(jnp.bfloat16)
    bo, bi = params["bo"], params["bi"]
    wd, bd = params["wd"], params["bd"]

    # Constant block-diagonal "same head" mask (computed once on the XLA side; Pallas keeps the
    # block resident across grid steps since its index_map is constant).
    hidx = jnp.arange(D, dtype=jnp.int32) // head_dim
    head_mask = (hidx[:, None] == hidx[None, :]).astype(jnp.float32)

    def full_spec(shape):
        nd = len(shape)
        return pl.BlockSpec(shape, lambda b, _nd=nd: (0,) * _nd)

    in_specs = [
        pl.BlockSpec((1, S, D), lambda b: (b, 0, 0)),     # x
        pl.BlockSpec((1, 6, D), lambda b: (b, 0, 0)),     # mod
        full_spec((D, D)),                                # head_mask
        full_spec((D, 3 * D)), full_spec((1, 3 * D)),     # wqkv, bqkv (fused projection)
        full_spec((D, D)), full_spec((1, D)),             # wo, bo
        full_spec((D, 2 * H)), full_spec((1, 2 * H)),     # wi, bi (inverted_conv)
        full_spec((3, 2 * H)), full_spec((1, 2 * H)),     # wd, bd (depth_conv, depthwise)
        full_spec((H, D)),                                # wp (point_conv, no bias)
    ]
    out_specs = pl.BlockSpec((1, S, D), lambda b: (b, 0, 0))

    # Explicit VMEM budget: double-buffered IO blocks + live f32 intermediates, ~30% headroom.
    def nbytes(shape, dtype):
        return math.prod(shape) * jnp.dtype(dtype).itemsize

    blocks = [((1, S, D), jnp.float32), ((1, 6, D), jnp.float32), ((D, D), jnp.float32),
              ((D, 3 * D), jnp.bfloat16), ((1, 3 * D), jnp.float32),
              ((D, D), jnp.bfloat16), ((1, D), jnp.float32),
              ((D, 2 * H), jnp.bfloat16), ((1, 2 * H), jnp.float32),
              ((3, 2 * H), jnp.float32), ((1, 2 * H), jnp.float32),
              ((H, D), jnp.bfloat16),
              ((1, S, D), jnp.float32)]                       # output block
    io_bytes = sum(2 * nbytes(s, d) for s, d in blocks)       # default double-buffering
    # qkv + kv + (q,k,v,num,den,attn) + (u, u_prev, u_next, y) intermediates, all f32.
    interm_bytes = 4 * (S * 3 * D + D * D + 6 * S * D + 4 * S * 2 * H)
    vmem_limit = int(min(100 * 2 ** 20, max(16 * 2 ** 20, 1.3 * (io_bytes + interm_bytes))))

    kernel = _make_block_kernel(S, D, H)
    fn = pl.pallas_call(
        kernel,
        out_shape=jax.ShapeDtypeStruct((B, S, D), jnp.float32),
        grid_spec=pltpu.PrefetchScalarGridSpec(
            num_scalar_prefetch=0,
            grid=(B,),
            in_specs=in_specs,
            out_specs=out_specs,
        ),
        compiler_params=pltpu.CompilerParams(
            dimension_semantics=("parallel",),      # batch elements are independent (v7x dual-TC)
            vmem_limit_bytes=vmem_limit),
    )
    return fn(x, mod, head_mask,
              wqkv, bqkv, wo, bo, wi, bi, wd, bd, wp)


if __name__ == "__main__":
    # Small shapes consistent with the module: dim = heads * head_dim.
    B, S = 2, 8
    dim = 32
    num_heads = 2
    head_dim = 16
    mlp_ratio = 4.0
    H = int(dim * mlp_ratio)            # GLUMBConv hidden_features = 128

    key = jax.random.PRNGKey(0)
    ks = jax.random.split(key, 18)

    def nrm(k, shape, scale=0.05):
        return jax.random.normal(k, shape, dtype=jnp.float32) * scale

    # Inputs
    x = jax.random.normal(ks[0], (B, S, dim), dtype=jnp.float32)
    temb = jax.random.normal(ks[1], (B, 6 * dim), dtype=jnp.float32) * 0.1

    # Parameters (deterministic, synthetic).
    # Linear/conv weights stored as (in, out) so kernels do  y = x @ W (+ b).
    scale_shift_table = jax.random.normal(ks[2], (6, dim), dtype=jnp.float32) / (dim ** 0.5)
    params = {
        "wq": nrm(ks[3], (dim, dim)),  "bq": nrm(ks[4], (1, dim)),
        "wk": nrm(ks[5], (dim, dim)),  "bk": nrm(ks[6], (1, dim)),
        "wv": nrm(ks[7], (dim, dim)),  "bv": nrm(ks[8], (1, dim)),
        "wo": nrm(ks[9], (dim, dim)),  "bo": nrm(ks[10], (1, dim)),
        "wi": nrm(ks[11], (dim, 2 * H)), "bi": nrm(ks[12], (1, 2 * H)),
        # depthwise Conv1d(2H, 2H, 3, groups=2H): torch weight (2H, 1, 3) -> stored as (3, 2H)
        "wd": nrm(ks[13], (3, 2 * H)),  "bd": nrm(ks[14], (1, 2 * H)),
        # point Conv1d(H, dim, 1, bias=False): torch weight (dim, H, 1) -> stored as (H, dim)
        "wp": nrm(ks[15], (H, dim)),
    }

    # adaLN-single modulation table (JAX glue, matches:
    #   scale_shift_table[None] + temb.reshape(N, 6, -1))
    mod = scale_shift_table[None, :, :] + temb.reshape(B, 6, dim)

    out = linear_transformer_block(x, mod, params, num_heads=num_heads)
    out = jax.block_until_ready(out)
    assert out.shape == (B, S, dim) and out.dtype == jnp.float32
    assert bool(jnp.all(jnp.isfinite(out)))
    print("KERNEL_OK")
</pallas_src>

<mosaic_0001>
module attributes {stable_mosaic.version = 11 : i64} {
  func.func @kernel(%arg0: i32, %arg1: memref<1x8x32xf32, #tpu.memory_space<vmem>>, %arg2: memref<1x6x32xf32, #tpu.memory_space<vmem>>, %arg3: memref<32x32xf32, #tpu.memory_space<vmem>>, %arg4: memref<32x96xbf16, #tpu.memory_space<vmem>>, %arg5: memref<1x96xf32, #tpu.memory_space<vmem>>, %arg6: memref<32x32xbf16, #tpu.memory_space<vmem>>, %arg7: memref<1x32xf32, #tpu.memory_space<vmem>>, %arg8: memref<32x256xbf16, #tpu.memory_space<vmem>>, %arg9: memref<1x256xf32, #tpu.memory_space<vmem>>, %arg10: memref<3x256xf32, #tpu.memory_space<vmem>>, %arg11: memref<1x256xf32, #tpu.memory_space<vmem>>, %arg12: memref<128x32xbf16, #tpu.memory_space<vmem>>, %arg13: memref<1x8x32xf32, #tpu.memory_space<vmem>>) attributes {dimension_semantics = [#tpu.dimension_semantics<parallel>], iteration_bounds = array<i64: 2>, scalar_prefetch = 0 : i64, scratch_operands = 0 : i64, tpu.core_type = #tpu.core_type<tc>, window_params = [{transform_indices = @transform_0, window_bounds = array<i64: 1, 8, 32>}, {transform_indices = @transform_1, window_bounds = array<i64: 1, 6, 32>}, {pipeline_mode = #tpu.pipeline_mode<synchronous>, transform_indices = @transform_2, window_bounds = array<i64: 32, 32>}, {pipeline_mode = #tpu.pipeline_mode<synchronous>, transform_indices = @transform_3, window_bounds = array<i64: 32, 96>}, {pipeline_mode = #tpu.pipeline_mode<synchronous>, transform_indices = @transform_4, window_bounds = array<i64: 1, 96>}, {pipeline_mode = #tpu.pipeline_mode<synchronous>, transform_indices = @transform_5, window_bounds = array<i64: 32, 32>}, {pipeline_mode = #tpu.pipeline_mode<synchronous>, transform_indices = @transform_6, window_bounds = array<i64: 1, 32>}, {pipeline_mode = #tpu.pipeline_mode<synchronous>, transform_indices = @transform_7, window_bounds = array<i64: 32, 256>}, {pipeline_mode = #tpu.pipeline_mode<synchronous>, transform_indices = @transform_8, window_bounds = array<i64: 1, 256>}, {pipeline_mode = #tpu.pipeline_mode<synchronous>, transform_indices = @transform_9, window_bounds = array<i64: 3, 256>}, {pipeline_mode = #tpu.pipeline_mode<synchronous>, transform_indices = @transform_10, window_bounds = array<i64: 1, 256>}, {pipeline_mode = #tpu.pipeline_mode<synchronous>, transform_indices = @transform_11, window_bounds = array<i64: 128, 32>}, {transform_indices = @transform_12, window_bounds = array<i64: 1, 8, 32>}]} {
    %c0 = arith.constant 0 : index
    %c0_0 = arith.constant 0 : index
    %c0_1 = arith.constant 0 : index
    %0 = vector.load %arg1[%c0, %c0_0, %c0_1] : memref<1x8x32xf32, #tpu.memory_space<vmem>>, vector<1x8x32xf32>
    %1 = vector.shape_cast %0 : vector<1x8x32xf32> to vector<8x32xf32>
    %c0_2 = arith.constant 0 : index
    %c0_3 = arith.constant 0 : index
    %c0_4 = arith.constant 0 : index
    %2 = vector.load %arg2[%c0_2, %c0_3, %c0_4] : memref<1x6x32xf32, #tpu.memory_space<vmem>>, vector<1x6x32xf32>
    %3 = vector.shape_cast %2 : vector<1x6x32xf32> to vector<6x32xf32>
    %4 = vector.extract_strided_slice %3 {offsets = [0, 0], sizes = [1, 32], strides = [1, 1]} : vector<6x32xf32> to vector<1x32xf32>
    %5 = vector.extract_strided_slice %3 {offsets = [1, 0], sizes = [1, 32], strides = [1, 1]} : vector<6x32xf32> to vector<1x32xf32>
    %6 = vector.extract_strided_slice %3 {offsets = [2, 0], sizes = [1, 32], strides = [1, 1]} : vector<6x32xf32> to vector<1x32xf32>
    %7 = vector.extract_strided_slice %3 {offsets = [3, 0], sizes = [1, 32], strides = [1, 1]} : vector<6x32xf32> to vector<1x32xf32>
    %8 = vector.extract_strided_slice %3 {offsets = [4, 0], sizes = [1, 32], strides = [1, 1]} : vector<6x32xf32> to vector<1x32xf32>
    %9 = vector.extract_strided_slice %3 {offsets = [5, 0], sizes = [1, 32], strides = [1, 1]} : vector<6x32xf32> to vector<1x32xf32>
    %c0_5 = arith.constant 0 : index
    %c0_6 = arith.constant 0 : index
    %10 = vector.load %arg3[%c0_5, %c0_6] : memref<32x32xf32, #tpu.memory_space<vmem>>, vector<32x32xf32>
    %11 = arith.mulf %1, %1 : vector<8x32xf32>
    %cst = arith.constant dense<0.000000e+00> : vector<8xf32>
    %12 = vector.multi_reduction <add>, %11, %cst [1] : vector<8x32xf32> to vector<8xf32>
    %13 = vector.shape_cast %12 : vector<8xf32> to vector<8x1xf32>
    %cst_7 = arith.constant 3.200000e+01 : f32
    %14 = vector.broadcast %cst_7 : f32 to vector<8x1xf32>
    %15 = arith.divf %13, %14 : vector<8x1xf32>
    %cst_8 = arith.constant 9.99999997E-7 : f32
    %16 = vector.broadcast %cst_8 : f32 to vector<8x1xf32>
    %17 = arith.addf %15, %16 : vector<8x1xf32>
    %18 = math.rsqrt %17 : vector<8x1xf32>
    %19 = vector.broadcast %18 : vector<8x1xf32> to vector<8x32xf32>
    %20 = arith.mulf %1, %19 : vector<8x32xf32>
    %cst_9 = arith.constant 1.000000e+00 : f32
    %21 = vector.broadcast %cst_9 : f32 to vector<1x32xf32>
    %22 = arith.addf %21, %5 : vector<1x32xf32>
    %23 = vector.broadcast %22 : vector<1x32xf32> to vector<8x32xf32>
    %24 = arith.mulf %20, %23 : vector<8x32xf32>
    %25 = vector.broadcast %4 : vector<1x32xf32> to vector<8x32xf32>
    %26 = arith.addf %24, %25 : vector<8x32xf32>
    %27 = arith.truncf %26 : vector<8x32xf32> to vector<8x32xbf16>
    %c0_10 = arith.constant 0 : index
    %c0_11 = arith.constant 0 : index
    %28 = vector.load %arg4[%c0_10, %c0_11] : memref<32x96xbf16, #tpu.memory_space<vmem>>, vector<32x96xbf16>
    %cst_12 = arith.constant dense<0.000000e+00> : vector<8x96xf32>
    %29 = tpu.matmul %27, %28, %cst_12 {dimension_numbers = #tpu.dot_dimension_numbers<[1], [0], [0], [1], [0, 0, 1, 1], [], []>} : vector<8x32xbf16>, vector<32x96xbf16>, vector<8x96xf32> -> vector<8x96xf32>
    %c0_13 = arith.constant 0 : index
    %c0_14 = arith.constant 0 : index
    %30 = vector.load %arg5[%c0_13, %c0_14] : memref<1x96xf32, #tpu.memory_space<vmem>>, vector<1x96xf32>
    %31 = vector.broadcast %30 : vector<1x96xf32> to vector<8x96xf32>
    %32 = arith.addf %29, %31 : vector<8x96xf32>
    %33 = vector.extract_strided_slice %32 {offsets = [0, 0], sizes = [8, 32], strides = [1, 1]} : vector<8x96xf32> to vector<8x32xf32>
    %cst_15 = arith.constant 0.000000e+00 : f32
    %34 = vector.broadcast %cst_15 : f32 to vector<8x32xf32>
    %35 = arith.maximumf %33, %34 : vector<8x32xf32>
    %36 = vector.extract_strided_slice %32 {offsets = [0, 32], sizes = [8, 32], strides = [1, 1]} : vector<8x96xf32> to vector<8x32xf32>
    %cst_16 = arith.constant 0.000000e+00 : f32
    %37 = vector.broadcast %cst_16 : f32 to vector<8x32xf32>
    %38 = arith.maximumf %36, %37 : vector<8x32xf32>
    %39 = vector.extract_strided_slice %32 {offsets = [0, 64], sizes = [8, 32], strides = [1, 1]} : vector<8x96xf32> to vector<8x32xf32>
    %cst_17 = arith.constant dense<0.000000e+00> : vector<32x32xf32>
    %40 = tpu.matmul %38, %39, %cst_17 {dimension_numbers = #tpu.dot_dimension_numbers<[0], [0], [1], [1], [0, 1, 1, 1], [], []>} : vector<8x32xf32>, vector<8x32xf32>, vector<32x32xf32> -> vector<32x32xf32>
    %41 = arith.mulf %40, %10 : vector<32x32xf32>
    %cst_18 = arith.constant dense<0.000000e+00> : vector<8x32xf32>
    %42 = tpu.matmul %35, %41, %cst_18 {dimension_numbers = #tpu.dot_dimension_numbers<[1], [0], [0], [1], [0, 0, 1, 1], [], []>} : vector<8x32xf32>, vector<32x32xf32>, vector<8x32xf32> -> vector<8x32xf32>
    %cst_19 = arith.constant dense<0.000000e+00> : vector<32xf32>
    %43 = vector.multi_reduction <add>, %38, %cst_19 [0] : vector<8x32xf32> to vector<32xf32>
    %44 = vector.shape_cast %43 : vector<32xf32> to vector<1x32xf32>
    %45 = vector.broadcast %44 : vector<1x32xf32> to vector<8x32xf32>
    %46 = arith.mulf %35, %45 : vector<8x32xf32>
    %cst_20 = arith.constant dense<0.000000e+00> : vector<8x32xf32>
    %47 = tpu.matmul %46, %10, %cst_20 {dimension_numbers = #tpu.dot_dimension_numbers<[1], [0], [0], [1], [0, 0, 1, 1], [], []>} : vector<8x32xf32>, vector<32x32xf32>, vector<8x32xf32> -> vector<8x32xf32>
    %cst_21 = arith.constant 1.000000e-15 : f32
    %48 = vector.broadcast %cst_21 : f32 to vector<8x32xf32>
    %49 = arith.addf %47, %48 : vector<8x32xf32>
    %50 = tpu.reciprocal %49 {approx = true} : vector<8x32xf32> -> vector<8x32xf32>
    %51 = arith.mulf %42, %50 : vector<8x32xf32>
    %52 = arith.truncf %51 : vector<8x32xf32> to vector<8x32xbf16>
    %c0_22 = arith.constant 0 : index
    %c0_23 = arith.constant 0 : index
    %53 = vector.load %arg6[%c0_22, %c0_23] : memref<32x32xbf16, #tpu.memory_space<vmem>>, vector<32x32xbf16>
    %cst_24 = arith.constant dense<0.000000e+00> : vector<8x32xf32>
    %54 = tpu.matmul %52, %53, %cst_24 {dimension_numbers = #tpu.dot_dimension_numbers<[1], [0], [0], [1], [0, 0, 1, 1], [], []>} : vector<8x32xbf16>, vector<32x32xbf16>, vector<8x32xf32> -> vector<8x32xf32>
    %c0_25 = arith.constant 0 : index
    %c0_26 = arith.constant 0 : index
    %55 = vector.load %arg7[%c0_25, %c0_26] : memref<1x32xf32, #tpu.memory_space<vmem>>, vector<1x32xf32>
    %56 = vector.broadcast %55 : vector<1x32xf32> to vector<8x32xf32>
    %57 = arith.addf %54, %56 : vector<8x32xf32>
    %58 = vector.broadcast %6 : vector<1x32xf32> to vector<8x32xf32>
    %59 = arith.mulf %58, %57 : vector<8x32xf32>
    %60 = arith.addf %1, %59 : vector<8x32xf32>
    %61 = arith.mulf %60, %60 : vector<8x32xf32>
    %cst_27 = arith.constant dense<0.000000e+00> : vector<8xf32>
    %62 = vector.multi_reduction <add>, %61, %cst_27 [1] : vector<8x32xf32> to vector<8xf32>
    %63 = vector.shape_cast %62 : vector<8xf32> to vector<8x1xf32>
    %cst_28 = arith.constant 3.200000e+01 : f32
    %64 = vector.broadcast %cst_28 : f32 to vector<8x1xf32>
    %65 = arith.divf %63, %64 : vector<8x1xf32>
    %cst_29 = arith.constant 9.99999997E-7 : f32
    %66 = vector.broadcast %cst_29 : f32 to vector<8x1xf32>
    %67 = arith.addf %65, %66 : vector<8x1xf32>
    %68 = math.rsqrt %67 : vector<8x1xf32>
    %69 = vector.broadcast %68 : vector<8x1xf32> to vector<8x32xf32>
    %70 = arith.mulf %60, %69 : vector<8x32xf32>
    %cst_30 = arith.constant 1.000000e+00 : f32
    %71 = vector.broadcast %cst_30 : f32 to vector<1x32xf32>
    %72 = arith.addf %71, %8 : vector<1x32xf32>
    %73 = vector.broadcast %72 : vector<1x32xf32> to vector<8x32xf32>
    %74 = arith.mulf %70, %73 : vector<8x32xf32>
    %75 = vector.broadcast %7 : vector<1x32xf32> to vector<8x32xf32>
    %76 = arith.addf %74, %75 : vector<8x32xf32>
    %77 = arith.truncf %76 : vector<8x32xf32> to vector<8x32xbf16>
    %c0_31 = arith.constant 0 : index
    %c0_32 = arith.constant 0 : index
    %78 = vector.load %arg8[%c0_31, %c0_32] : memref<32x256xbf16, #tpu.memory_space<vmem>>, vector<32x256xbf16>
    %cst_33 = arith.constant dense<0.000000e+00> : vector<8x256xf32>
    %79 = tpu.matmul %77, %78, %cst_33 {dimension_numbers = #tpu.dot_dimension_numbers<[1], [0], [0], [1], [0, 0, 1, 1], [], []>} : vector<8x32xbf16>, vector<32x256xbf16>, vector<8x256xf32> -> vector<8x256xf32>
    %c0_34 = arith.constant 0 : index
    %c0_35 = arith.constant 0 : index
    %80 = vector.load %arg9[%c0_34, %c0_35] : memref<1x256xf32, #tpu.memory_space<vmem>>, vector<1x256xf32>
    %81 = vector.broadcast %80 : vector<1x256xf32> to vector<8x256xf32>
    %82 = arith.addf %79, %81 : vector<8x256xf32>
    %83 = arith.negf %82 : vector<8x256xf32>
    %84 = math.exp %83 : vector<8x256xf32>
    %cst_36 = arith.constant 1.000000e+00 : f32
    %85 = vector.broadcast %cst_36 : f32 to vector<8x256xf32>
    %86 = arith.addf %85, %84 : vector<8x256xf32>
    %87 = arith.divf %85, %86 : vector<8x256xf32>
    %88 = arith.mulf %82, %87 : vector<8x256xf32>
    %c0_37 = arith.constant 0 : index
    %c0_38 = arith.constant 0 : index
    %89 = vector.load %arg10[%c0_37, %c0_38] : memref<3x256xf32, #tpu.memory_space<vmem>>, vector<3x256xf32>
    %90 = tpu.iota {dimensions = array<i32: 0>} : vector<8x256xi32>
    %c0_i32 = arith.constant 0 : i32
    %91 = vector.broadcast %c0_i32 : i32 to vector<8x256xi32>
    %92 = arith.cmpi eq, %90, %91 : vector<8x256xi32>
    %c1_i32 = arith.constant 1 : i32
    %93 = tpu.dynamic_rotate %88 by %c1_i32 dim 0 : vector<8x256xf32>, i32 -> vector<8x256xf32>
    %cst_39 = arith.constant 0.000000e+00 : f32
    %94 = vector.broadcast %cst_39 : f32 to vector<8x256xf32>
    %95 = arith.select %92, %94, %93 : vector<8x256xi1>, vector<8x256xf32>
    %c7_i32 = arith.constant 7 : i32
    %96 = vector.broadcast %c7_i32 : i32 to vector<8x256xi32>
    %97 = arith.cmpi eq, %90, %96 : vector<8x256xi32>
    %c7_i32_40 = arith.constant 7 : i32
    %98 = tpu.dynamic_rotate %88 by %c7_i32_40 dim 0 : vector<8x256xf32>, i32 -> vector<8x256xf32>
    %cst_41 = arith.constant 0.000000e+00 : f32
    %99 = vector.broadcast %cst_41 : f32 to vector<8x256xf32>
    %100 = arith.select %97, %99, %98 : vector<8x256xi1>, vector<8x256xf32>
    %101 = vector.extract_strided_slice %89 {offsets = [0, 0], sizes = [1, 256], strides = [1, 1]} : vector<3x256xf32> to vector<1x256xf32>
    %102 = vector.broadcast %101 : vector<1x256xf32> to vector<8x256xf32>
    %103 = arith.mulf %95, %102 : vector<8x256xf32>
    %104 = vector.extract_strided_slice %89 {offsets = [1, 0], sizes = [1, 256], strides = [1, 1]} : vector<3x256xf32> to vector<1x256xf32>
    %105 = vector.broadcast %104 : vector<1x256xf32> to vector<8x256xf32>
    %106 = arith.mulf %88, %105 : vector<8x256xf32>
    %107 = arith.addf %103, %106 : vector<8x256xf32>
    %108 = vector.extract_strided_slice %89 {offsets = [2, 0], sizes = [1, 256], strides = [1, 1]} : vector<3x256xf32> to vector<1x256xf32>
    %109 = vector.broadcast %108 : vector<1x256xf32> to vector<8x256xf32>
    %110 = arith.mulf %100, %109 : vector<8x256xf32>
    %111 = arith.addf %107, %110 : vector<8x256xf32>
    %c0_42 = arith.constant 0 : index
    %c0_43 = arith.constant 0 : index
    %112 = vector.load %arg11[%c0_42, %c0_43] : memref<1x256xf32, #tpu.memory_space<vmem>>, vector<1x256xf32>
    %113 = vector.broadcast %112 : vector<1x256xf32> to vector<8x256xf32>
    %114 = arith.addf %111, %113 : vector<8x256xf32>
    %115 = vector.extract_strided_slice %114 {offsets = [0, 0], sizes = [8, 128], strides = [1, 1]} : vector<8x256xf32> to vector<8x128xf32>
    %116 = vector.extract_strided_slice %114 {offsets = [0, 128], sizes = [8, 128], strides = [1, 1]} : vector<8x256xf32> to vector<8x128xf32>
    %117 = arith.negf %116 : vector<8x128xf32>
    %118 = math.exp %117 : vector<8x128xf32>
    %cst_44 = arith.constant 1.000000e+00 : f32
    %119 = vector.broadcast %cst_44 : f32 to vector<8x128xf32>
    %120 = arith.addf %119, %118 : vector<8x128xf32>
    %121 = arith.divf %119, %120 : vector<8x128xf32>
    %122 = arith.mulf %116, %121 : vector<8x128xf32>
    %123 = arith.mulf %115, %122 : vector<8x128xf32>
    %124 = arith.truncf %123 : vector<8x128xf32> to vector<8x128xbf16>
    %c0_45 = arith.constant 0 : index
    %c0_46 = arith.constant 0 : index
    %125 = vector.load %arg12[%c0_45, %c0_46] : memref<128x32xbf16, #tpu.memory_space<vmem>>, vector<128x32xbf16>
    %cst_47 = arith.constant dense<0.000000e+00> : vector<8x32xf32>
    %126 = tpu.matmul %124, %125, %cst_47 {dimension_numbers = #tpu.dot_dimension_numbers<[1], [0], [0], [1], [0, 0, 1, 1], [], []>} : vector<8x128xbf16>, vector<128x32xbf16>, vector<8x32xf32> -> vector<8x32xf32>
    %127 = vector.broadcast %9 : vector<1x32xf32> to vector<8x32xf32>
    %128 = arith.mulf %127, %126 : vector<8x32xf32>
    %129 = arith.addf %60, %128 : vector<8x32xf32>
    %c0_48 = arith.constant 0 : index
    %c0_49 = arith.constant 0 : index
    %c0_50 = arith.constant 0 : index
    %130 = vector.load %arg13[%c0_48, %c0_49, %c0_50] : memref<1x8x32xf32, #tpu.memory_space<vmem>>, vector<1x8x32xf32>
    %131 = vector.shape_cast %130 : vector<1x8x32xf32> to vector<8x32xf32>
    %132 = vector.shape_cast %129 : vector<8x32xf32> to vector<1x8x32xf32>
    tpu.vector_store %arg13[%c0_48, %c0_49, %c0_50], %132 {strides = array<i32>} : memref<1x8x32xf32, #tpu.memory_space<vmem>>, vector<1x8x32xf32>,
    return
  }
  func.func @transform_0(%arg0: i32) -> (i32, i32, i32) {
    %c0_i32 = arith.constant 0 : i32
    %c0_i32_0 = arith.constant 0 : i32
    %c0_i32_1 = arith.constant 0 : i32
    return %arg0, %c0_i32, %c0_i32_0 : i32, i32, i32
  }
  func.func @transform_1(%arg0: i32) -> (i32, i32, i32) {
    %c0_i32 = arith.constant 0 : i32
    %c0_i32_0 = arith.constant 0 : i32
    %c0_i32_1 = arith.constant 0 : i32
    return %arg0, %c0_i32, %c0_i32_0 : i32, i32, i32
  }
  func.func @transform_2(%arg0: i32) -> (i32, i32) {
    %c0_i32 = arith.constant 0 : i32
    %c0_i32_0 = arith.constant 0 : i32
    %c0_i32_1 = arith.constant 0 : i32
    return %c0_i32, %c0_i32_0 : i32, i32
  }
  func.func @transform_3(%arg0: i32) -> (i32, i32) {
    %c0_i32 = arith.constant 0 : i32
    %c0_i32_0 = arith.constant 0 : i32
    %c0_i32_1 = arith.constant 0 : i32
    return %c0_i32, %c0_i32_0 : i32, i32
  }
  func.func @transform_4(%arg0: i32) -> (i32, i32) {
    %c0_i32 = arith.constant 0 : i32
    %c0_i32_0 = arith.constant 0 : i32
    %c0_i32_1 = arith.constant 0 : i32
    return %c0_i32, %c0_i32_0 : i32, i32
  }
  func.func @transform_5(%arg0: i32) -> (i32, i32) {
    %c0_i32 = arith.constant 0 : i32
    %c0_i32_0 = arith.constant 0 : i32
    %c0_i32_1 = arith.constant 0 : i32
    return %c0_i32, %c0_i32_0 : i32, i32
  }
  func.func @transform_6(%arg0: i32) -> (i32, i32) {
    %c0_i32 = arith.constant 0 : i32
    %c0_i32_0 = arith.constant 0 : i32
    %c0_i32_1 = arith.constant 0 : i32
    return %c0_i32, %c0_i32_0 : i32, i32
  }
  func.func @transform_7(%arg0: i32) -> (i32, i32) {
    %c0_i32 = arith.constant 0 : i32
    %c0_i32_0 = arith.constant 0 : i32
    %c0_i32_1 = arith.constant 0 : i32
    return %c0_i32, %c0_i32_0 : i32, i32
  }
  func.func @transform_8(%arg0: i32) -> (i32, i32) {
    %c0_i32 = arith.constant 0 : i32
    %c0_i32_0 = arith.constant 0 : i32
    %c0_i32_1 = arith.constant 0 : i32
    return %c0_i32, %c0_i32_0 : i32, i32
  }
  func.func @transform_9(%arg0: i32) -> (i32, i32) {
    %c0_i32 = arith.constant 0 : i32
    %c0_i32_0 = arith.constant 0 : i32
    %c0_i32_1 = arith.constant 0 : i32
    return %c0_i32, %c0_i32_0 : i32, i32
  }
  func.func @transform_10(%arg0: i32) -> (i32, i32) {
    %c0_i32 = arith.constant 0 : i32
    %c0_i32_0 = arith.constant 0 : i32
    %c0_i32_1 = arith.constant 0 : i32
    return %c0_i32, %c0_i32_0 : i32, i32
  }
  func.func @transform_11(%arg0: i32) -> (i32, i32) {
    %c0_i32 = arith.constant 0 : i32
    %c0_i32_0 = arith.constant 0 : i32
    %c0_i32_1 = arith.constant 0 : i32
    return %c0_i32, %c0_i32_0 : i32, i32
  }
  func.func @transform_12(%arg0: i32) -> (i32, i32, i32) {
    %c0_i32 = arith.constant 0 : i32
    %c0_i32_0 = arith.constant 0 : i32
    %c0_i32_1 = arith.constant 0 : i32
    return %arg0, %c0_i32, %c0_i32_0 : i32, i32, i32
  }
}

</mosaic_0001>

<bundles_post_ra>
// kernel: tpu_custom_call.1
= control target key start
LH: loop header
LB: loop body
LE: loop exit
PB: predicated region body
PF: predicated region fallthrough
CT: control target
= control target key end

     0   :  { %17 = vsyncpa [#allocation3], 0  ;;  %s1759_s0 = inlined_call_operand.vmem [shape: f32[2,8,32], index: 0, kind: input, shape index: {}]   ;;  %s1760_s1 = inlined_call_operand.vmem [shape: f32[2,6,32], index: 1, kind: input, shape index: {}]   ;;  %s1761_s2 = inlined_call_operand.vmem [shape: f32[32,32], index: 2, kind: input, shape index: {}]   ;;  %s1762_s3 = inlined_call_operand.hbm [shape: bf16[32,96], index: 3, kind: input, shape index: {}]   ;;  %s1763_s4 = inlined_call_operand.vmem [shape: f32[1,96], index: 4, kind: input, shape index: {}]   ;;  %s1764_s5 = inlined_call_operand.hbm [shape: bf16[32,32], index: 5, kind: input, shape index: {}]   ;;  %s1765_s6 = inlined_call_operand.vmem [shape: f32[1,32], index: 6, kind: input, shape index: {}]   ;;  %s1766_s7 = inlined_call_operand.vmem [shape: bf16[32,256], index: 7, kind: input, shape index: {}]   ;;  %s1767_s8 = inlined_call_operand.vmem [shape: f32[1,256], index: 8, kind: input, shape index: {}]   ;;  %s1768_s9 = inlined_call_operand.vmem [shape: f32[3,256], index: 9, kind: input, shape index: {}]   ;;  %s1769_s10 = inlined_call_operand.vmem [shape: f32[1,256], index: 10, kind: input, shape index: {}]   ;;  %s1770_s11 = inlined_call_operand.vmem [shape: bf16[128,32], index: 11, kind: input, shape index: {}]   ;;  %s1771_s12 = inlined_call_operand.hbm [shape: f32[2,8,32], index: 12, kind: output, shape index: {}]  }
   0x1   :  { %18 = vsyncpa [#allocation6], 0 }
   0x2   :  { %19 = vsyncpa [#allocation4], 0 }
   0x3   :  { %21 = vsyncpa [#allocation4 + $0x1], 0  ;;  %s1504_s21 = smov 0   ;;  %s1506_s22 = smov 0  }
   0x4   :  { %s1508_s23 = smov 0   ;;  %s1510_s24 = smov 0  }
   0x5 LB: > { %1775 = sst [smem:[#allocation11_spill]] %s1426_s23  ;;  %s1525_s25 = sadd.s32 4294967295, %s1430_s24   ;;  %s1430_s24 = sphi %s1510_s24, %s1781_s24   ;;  %s1426_s23 = sphi %s1508_s23, %s1783_s23   ;;  %s1422_s22 = sphi %s1506_s22, %s1785_s22   ;;  %s1418_s21 = sphi %s1504_s21, %s1784_s21  }
   0x6   : > { %s1104_s26 = sadd.s32 4294967294, %s1430_s24   ;;  %s1529_s27 = sadd.s32 1, %s1430_s24  }
   0x7   : > { %1776 = sst [smem:[#allocation12_spill]] %s1529_s27  ;;  %s296_s28 = sadd.s32 1, %s1426_s23 }
   0x8   : > { %s293_s29 = ssub.s32 %s1430_s24, %s1529_s27  ;;  %p306_p0 = scmp.ne.s32.totalorder %s1426_s23, %s1422_s22 }
   0x9   : > { %p294_p1 = scmp.eq.s32.totalorder %s293_s29, 0  ;;  %p307_p2 = scmp.eq.s32.totalorder %s1525_s25, 1 }
   0xa   : > { %p312_p3 = scmp.ne.s32.totalorder %s1422_s22, %s1418_s21  ;;  %p313_p4 = scmp.eq.s32.totalorder %s1104_s26, 1 }
   0xb   : > { %s1540_s30 = scalar_select %p294_p1, %s1426_s23, %s296_s28  }
   0xc   : > { %p1542_p5 = por %p307_p2, %p306_p0  ;;  %p1546_p6 = por %p313_p4, %p312_p3 }
   0xd   : > { %1777 = sst [smem:[#allocation13_spill]] %s1540_s30  ;;  %p1105_p7 = scmp.ge.s32.totalorder %s1430_s24, 1 }
   0xe   : > { %p320_p8 = scmp.lt.s32.totalorder %s1430_s24, 3  ;;  %p1233_p9 = scmp.eq.s32.totalorder %s1525_s25, 0 }
   0xf   : > { %s334_s18 = sshll.u32 %s1762_s3, 4  ;;  %s1432_s19 = smov [#allocation2]   ;;  %s335_s18 = int_to_ptr.hbm [resolvable:$true] %s334_s18 }
  0x10   : > { %p1553_p10 = pnand %p1105_p7, %p320_p8  ;;  %s336_s20 = sshll.u32 %s1432_s19, 4  ;;  %s337_s20 = int_to_ptr.vmem [resolvable:$true] %s336_s20 }
  0x11   : > { %s351_s29 = sshll.u32 %s1764_s5, 4  ;;  %s1433_s30 = smov 64   ;;  %s352_s29 = int_to_ptr.hbm [resolvable:$true] %s351_s29 }
  0x12   : > { %p1222_p11 = pneg %p1553_p10  ;;  %s1434_s23 = smov 4  }
  0x13   : > { %s1435_s27 = smov [#allocation5]   ;;  %401 = sbr.rel (%p1553_p10) target bundleno = 1512 (0x5e8), region = 68 }
  0x14   : > { %p1223_p12 = pnand %p1233_p9, %p1222_p11  ;;  %s353_s16 = sshll.u32 %s1435_s27, 4  ;;  %s354_s16 = int_to_ptr.vmem [resolvable:$true] %s353_s16 }
  0x16   : > { %1225 = dma.hbm_to_vmem [thread:$0]  (!%p1223_p12), %s335_s18, 256, %s337_s20, [#allocation3], %s1433_s30, %s1433_s30, %s1434_s23  }
  0x17   : > { %1228 = dma.hbm_to_vmem [thread:$0]  (!%p1223_p12), %s352_s29, 256, %s354_s16, [#allocation6], %s1433_s30, %s1433_s30, %s1434_s23  }
  0x18   : > { %1405 = dma.done.wait (%p1233_p9), [#allocation3], 256  }
  0x19   : > { %1407 = vsyncadd (%p1233_p9), [#allocation3], 4294967040 }
  0x1a   : > { %1409 = dma.done.wait (%p1233_p9), [#allocation6], 256  }
  0x1b   : > { %1411 = vsyncadd (%p1233_p9), [#allocation6], 4294967040  ;;  %p452_p13 = scmp.lt.s32.totalorder %s1525_s25, 1  ;;  %vm468_vm0 = vcmask 261120   ;;  %v1436_v3 = vmov 32.0   ;;  %v1197_v8 = vld [vmem:[#allocation2 + $0x8] sm:$0xff] }
  0x1c   : > { %1280 = vrcp.f32 %v1436_v3  ;;  %527 = vmatpush.bf16.msra.mxu0 %v1197_v8  ;;  %v1196_v9 = vld [vmem:[#allocation2] sm:$0xff]  ;;  %v466_v30 = vld [vmem:[%s1761_s2 + $0x18] sm:$0xff]  ;;  %v465_v31 = vld [vmem:[%s1761_s2 + $0x10] sm:$0xff]  ;;  %vm643_vm5 = vcmask 523520   ;;  %s1438_s18 = smov 96   ;;  %vm575_vm6 = vcmask 64512  }
  0x1d   : > { %s453_s27 = scalar_select %p452_p13, %s1525_s25, 1  ;;  %671 = vmatpush.msra.mxu3 %v466_v30  ;;  %v464_v32 = vld [vmem:[%s1761_s2 + $0x8] sm:$0xff]  ;;  %v1278_v33 = vld [vmem:[%s1763_s4] ss:$0 sm:$0xff]  ;;  %v1199_v62 = vld [vmem:[#allocation5 + $0x8] sm:$0xff] }
  0x1e   : > { %v463_v45 = vld [vmem:[%s1761_s2] sm:$0xff]  ;;  %v1198_v63 = vld [vmem:[#allocation5] sm:$0xff]  ;;  %s1193_s30 = sshll.u32 %s1525_s25, 3 }
  0x1f   : > { %s1113_s23 = sshll.u32 %s453_s27, 3  ;;  %672 = vmatpush.msra.mxu3 %v465_v31  ;;  %s449_s27 = sand.u32 1, %s1422_s22  }
  0x20   : > { %s455_s17 = scalar_lea.vmem %s1759_s0, %s1113_s23  ;;  %528 = vmatpush.bf16.msra.mxu0 %v1196_v9  ;;  %s459_s20 = scalar_lea.vmem %s1760_s1, %s1113_s23 }
  0x21   : > { %v1582_v0 = vld [vmem:[%s455_s17] sm:$0xff]  ;;  %673 = vmatpush.msra.mxu3 %v464_v32  ;;  %s1437_s17 = smov 64   ;;  %s1112_s23 = sshll.u32 %s449_s27, 3 }
  0x22   : > { %v467_v1 = vmul.f32 %v1582_v0, %v1582_v0  ;;  %v1281_v4 = vpop.eup %1280  ;;  %v1593_v17 = vld [vmem:[%s459_s20] sm:$0x3f]  ;;  %s451_s19 = scalar_lea.vmem [#allocation7], %s1112_s23  ;;  %s996_s28 = scalar_lea.sflag [#allocation4], %s449_s27 }
  0x23   : > { %v473_v5 = vmul.f32 32.0, %v1281_v4  ;;  %vm477_vm1 = vweird.f32 %v1281_v4  ;;  %v1596_v20 = vadd.f32 1.0, %v1593_v17  ;;  %v495_v26 = vperm.slane %v1593_v17, 0  ;;  %674 = vmatpush.msra.mxu3 %v463_v45  ;;  %s1008_s20 = sshll.u32 %s451_s19, 4  ;;  %s1380_s23 = scalar_lea.hbm %s1771_s12, 16  ;;  %s1009_s20 = int_to_ptr.vmem [resolvable:$true] %s1008_s20 }
  0x24   : > { %v469_v2 = vsel %vm468_vm0, %v467_v1, 0.0  ;;  %v718_v8 = vperm.slane %v1593_v17, 2 }
  0x25   : > { %470 = vadd.xlane.f32.xlu0 %v469_v2  ;;  %v474_v6 = vsub.f32 1.0, %v473_v5  ;;  %v493_v23 = vperm.slane %v1596_v20, 1 }
  0x27   : > { %v475_v7 = vmul.f32 %v1281_v4, %v474_v6 }
  0x29   : > { %v476_v10 = vadd.f32 %v1281_v4, %v475_v7  ;;  %v1279_v7 = vld [vmem:[%s1765_s6] ss:$0 sm:$0xff] }
  0x2b   : > { %v1587_v11 = vsel %vm477_vm1, %v1281_v4, %v476_v10 }
  0x98   : > { %v471_v12 = vpop.xlane.xlu0 %470 }
  0x99   : > { %v479_v13 = vmul.f32 %v1587_v11, %v471_v12 }
  0x9b   : > { %v480_v14 = vadd.f32 1e-06, %v479_v13 }
  0x9d   : > { %1282 = vrsqrt.f32 %v480_v14  ;;  %vm487_vm3 = vweird.f32 %v480_v14 }
  0xa3   : > { %v1283_v15 = vpop.eup %1282 }
  0xa4   : > { %v482_v16 = vmul.f32 %v1283_v15, %v480_v14  ;;  %vm488_vm2 = vweird.f32 %v1283_v15 }
  0xa5   : > { %vm489_vm4 = vmor %vm487_vm3, %vm488_vm2 }
  0xa6   : > { %v483_v18 = vmul.f32 %v1283_v15, %v482_v16 }
  0xa8   : > { %v484_v19 = vmul.f32 0.5, %v483_v18  ;;  %v1202_v18 = vld [vmem:[%s1766_s7 + $0x14] sm:$0xf] }
  0xaa   : > { %v485_v21 = vsub.f32 1.5, %v484_v19  ;;  %v1151_v19 = vld [vmem:[%s1766_s7 + $0x18] sm:$0xf0] }
  0xac   : > { %v486_v22 = vmul.f32 %v1283_v15, %v485_v21  ;;  %v1154_v21 = vor.u32 %v1202_v18, %v1151_v19 }
  0xae   : > { %v490_v24 = vsel %vm489_vm4, %v1283_v15, %v486_v22  ;;  %v1203_v22 = vld [vmem:[%s1766_s7 + $0x14] sm:$0xf0]  ;;  %795 = vmatpush.bf16.msrb.mxu0 %v1154_v21 }
  0xaf   : > { %v491_v25 = vmul.f32 %v490_v24, %v1582_v0  ;;  %v1143_v24 = vld [vmem:[%s1766_s7 + $0x8] sm:$0xf0] }
  0xb1   : > { %v494_v27 = vmul.f32 %v493_v23, %v491_v25  ;;  %v1200_v23 = vld [vmem:[%s1766_s7 + $0x4] sm:$0xf] }
  0xb3   : > { %v496_v28 = vadd.f32 %v495_v26, %v494_v27  ;;  %v1141_v26 = vld [vmem:[%s1766_s7] sm:$0xf]  ;;  %v1146_v27 = vor.u32 %v1200_v23, %v1143_v24 }
  0xb5   : > { %v497_v29 = vpack.c.bf16 %v496_v28, %v496_v28  ;;  %v1201_v28 = vld [vmem:[%s1766_s7 + $0x4] sm:$0xf0]  ;;  %796 = vmatpush.bf16.msrb.mxu0 %v1146_v27 }
  0xb7   : > { %1123 = vmatmul.msk.bf16.vlgmr.msra.gmra.mxu0 %vm468_vm0, %v497_v29  ;;  %v1142_v29 = vor.u32 %v1201_v28, %v1141_v26 }
 0x134   : > { %v530_v34 = vpop.f32.mrf.mxu0 }
 0x135   : > { %v531_v35 = vadd.f32 %v1278_v33, %v530_v34 }
 0x137   : > { %v534_v36 = vmax.f32 %v531_v35, 0.0  ;;  %572 = vrot.lane.b32.xlu1 %v531_v35, %s1437_s17 }
 0x139   : > { %536 = vrot.lane.b32.xlu0 %v534_v36, %s1438_s18  ;;  %v644_v37 = vsel %vm643_vm5, %v534_v36, 0.0 }
 0x13a   : > { %v645_v38 = vrot.slane %v644_v37, 4 }
 0x13c   : > { %v532_v39 = vpop.f32.mrf.mxu0  ;;  %v646_v40 = vadd.f32 %v645_v38, %v644_v37 }
 0x13d   : > { %v738_v39 = vperm.slane %v1596_v20, 4 }
 0x13e   : > { %v647_v41 = vrot.slane %v646_v40, 2 }
 0x140   : > { %v648_v42 = vadd.f32 %v647_v41, %v646_v40 }
 0x142   : > { %v649_v43 = vrot.slane %v648_v42, 1 }
 0x144   : > { %v650_v44 = vadd.f32 %v649_v43, %v648_v42  ;;  %v740_v42 = vperm.slane %v1593_v17, 3 }
 0x146   : > { %652 = vrot.lane.b32.xlu2 %v650_v44, %s1438_s18  ;;  %s1006_s18 = scalar_lea.hbm %s1771_s12, %s1193_s30 }
 0x147   : > { %s1010_s26 = sshll.u32 %s1006_s18, 4  ;;  %s1011_s26 = int_to_ptr.hbm [resolvable:$true] %s1010_s26 }
 0x148   : > { %s1374_s25 = sshra.s32 %s1011_s26, 4  ;;  %s1375_s25 = int_to_ptr.hbm [resolvable:$true] %s1374_s25 }
 0x149   : > { %s1376_s29 = scalar_lea.hbm %s1375_s25, 8  ;;  %p1381_p3 = scmp.lt.s32.totalorder %s1375_s25, %s1771_s12 }
 0x14a   : > { %p1377_p0 = scmp.ne.s32.totalorder %s1375_s25, %s1376_s29  ;;  %p1382_p4 = scmp.lt.s32.totalorder %s1380_s23, %s1376_s29 }
 0x14c   : > { %p1378_p1 = pnand %p1377_p0, %p1542_p5  ;;  %p1383_p7 = por %p1382_p4, %p1381_p3 }
 0x14e   : > { %p1379_p2 = pneg %p1378_p1 }
 0x150   : > { %p1384_p8 = pnand %p1383_p7, %p1379_p2 }
 0x1a0   : > { %v653_v46 = vpop.permute.xlu2 %652 }
 0x1a1   : > { %v655_v47 = vmul.f32 %v653_v46, %v534_v36 }
 0x1a3   : > { %1129 = vmatmul.msk.f32.vlgmr.msra.gmra.mxu3 %vm468_vm0, %v655_v47 }
 0x1a9   : > { %v573_v48 = vpop.permute.xlu1 %572 }
 0x1aa   : > { %603 = vmatpush.msra.mxu1 %v573_v48 }
 0x1ab   : > { %v537_v49 = vpop.permute.xlu0 %536 }
 0x1ac   : > { %539 = vxpose.xlu1.b32.start.end [1/1] (short) (narrow) %v537_v49, 32 }
 0x226   : > { %v676_v1 = vpop.f32.mrf.mxu3 }
 0x227   : > { %v677_v2 = vadd.f32 1e-15, %v676_v1  ;;  %v1208_v1 = vld [vmem:[%s1770_s11 + $0x20] sm:$0xff] }
 0x229   : > { %1284 = vrcp.f32 %v677_v2 }
 0x22f   : > { %v1285_v3 = vpop.eup %1284 }
 0x250   : > { %v555_v50 = vpop.trf.xlu1 }
 0x251   : > { %1124 = vmatmul.msk.f32.vlgmr.msra.gmra.mxu1 %vm575_vm6, %v555_v50 }
 0x258   : > { %v556_v51 = vpop.trf.xlu1 }
 0x259   : > { %1125 = vmatmul.msk.f32.gmra.mxu1 %vm575_vm6, %v556_v51 }
 0x260   : > { %v557_v52 = vpop.trf.xlu1 }
 0x261   : > { %1126 = vmatmul.msk.f32.gmra.mxu1 %vm575_vm6, %v557_v52 }
 0x268   : > { %v558_v53 = vpop.trf.xlu1 }
 0x269   : > { %1127 = vmatmul.msk.f32.gmra.mxu1 %vm575_vm6, %v558_v53 }
 0x2ce   : > { %v605_v54 = vpop.f32.mrf.mxu1 }
 0x2cf   : > { %v617_v61 = vmul.f32 %v605_v54, %v463_v45  ;;  %v747_v45 = vld [vmem:[%s1767_s8] sm:$0x3] }
 0x2d0   : > { %v750_v46 = vperm.slane %v747_v45, 1  ;;  %v749_v49 = vperm.slane %v747_v45, 0 }
 0x2d6   : > { %v608_v55 = vpop.f32.mrf.mxu1 }
 0x2d7   : > { %v618_v60 = vmul.f32 %v608_v55, %v464_v32 }
 0x2de   : > { %v611_v56 = vpop.f32.mrf.mxu1 }
 0x2df   : > { %v619_v59 = vmul.f32 %v611_v56, %v465_v31  ;;  %v1211_v56 = vld [vmem:[%s1770_s11 + $0x38] sm:$0xff] }
 0x2e0   : > { %978 = vmatpush.bf16.msrb.mxu1 %v1211_v56 }
 0x2e6   : > { %v614_v57 = vpop.f32.mrf.mxu1 }
 0x2e7   : > { %v620_v58 = vmul.f32 %v614_v57, %v466_v30 }
 0x2e9   : > { %635 = vmatpush.msra.mxu2 %v620_v58  ;;  %v1210_v58 = vld [vmem:[%s1770_s11 + $0x30] sm:$0xff] }
 0x2ea   : > { %979 = vmatpush.bf16.msrb.mxu1 %v1210_v58 }
 0x2eb   : > { %636 = vmatpush.msra.mxu2 %v619_v59 }
 0x2ed   : > { %637 = vmatpush.msra.mxu2 %v618_v60 }
 0x2ef   : > { %638 = vmatpush.msra.mxu2 %v617_v61  ;;  %v1209_v61 = vld [vmem:[%s1770_s11 + $0x28] sm:$0xff] }
 0x2f0   : > { %1128 = vmatmul.msk.f32.vlgmr.msra.gmra.mxu2 %vm468_vm0, %v534_v36  ;;  %980 = vmatpush.bf16.msrb.mxu1 %v1209_v61 }
 0x2f1   : > { %711 = vmatpush.bf16.msrb.mxu2 %v1199_v62 }
 0x2f4   : > { %981 = vmatpush.bf16.msrb.mxu1 %v1208_v1 }
 0x2f5   : > { %712 = vmatpush.bf16.msrb.mxu2 %v1198_v63 }
 0x373   : > { %v640_v4 = vpop.f32.mrf.mxu2 }
 0x374   : > { %v680_v5 = vmul.f32 %v1285_v3, %v640_v4  ;;  %v843_v4 = vlaneseq }
 0x376   : > { %v681_v6 = vpack.c.bf16 %v680_v5, %v680_v5 }
 0x378   : > { %1138 = vmatmul.msk.bf16.vlgmr.msrb.gmra.mxu2 %vm468_vm0, %v681_v6 }
 0x3fb   : > { %v714_v9 = vpop.f32.mrf.mxu2 }
 0x3fc   : > { %v715_v10 = vadd.f32 %v1279_v7, %v714_v9  ;;  %v1684_v7 = vld [vmem:[%s1768_s9] sm:$0x77]  ;;  %v1207_v9 = vld [vmem:[%s1770_s11 + $0x18] sm:$0xff] }
 0x3fd   : > { %v865_v18 = vperm.slane %v1684_v7, 5  ;;  %v875_v21 = vperm.slane %v1684_v7, 6  ;;  %982 = vmatpush.bf16.msrb.mxu1 %v1207_v9  ;;  %v874_v58 = vperm.slane %v1684_v7, 2 }
 0x3fe   : > { %v719_v12 = vmul.f32 %v718_v8, %v715_v10 }
 0x3ff   : > { %v869_v26 = vperm.slane %v865_v18, 1 }
 0x400   : > { %v1625_v13 = vadd.f32 %v719_v12, %v1582_v0  ;;  %v1149_v0 = vld [vmem:[%s1766_s7 + $0x10] sm:$0xf] }
 0x401   : > { %v1150_v25 = vor.u32 %v1203_v22, %v1149_v0  ;;  %v1206_v22 = vld [vmem:[%s1770_s11 + $0x10] sm:$0xff] }
 0x402   : > { %v721_v14 = vmul.f32 %v1625_v13, %v1625_v13  ;;  %983 = vmatpush.bf16.msrb.mxu1 %v1206_v22 }
 0x403   : > { %v716_v15 = vpop.f32.mrf.mxu2  ;;  %782 = vmatpush.bf16.msrb.mxu3 %v1150_v25 }
 0x404   : > { %v722_v16 = vsel %vm468_vm0, %v721_v14, 0.0  ;;  %v1690_v15 = vshrl.u32 %v843_v4, 7 }
 0x405   : > { %723 = vadd.xlane.f32.xlu2 %v722_v16  ;;  %v857_v16 = vperm.slane %v1684_v7, 4 }
 0x406   : > { %vm845_vm14 = vcmp.eq.s32.totalorder %v1690_v15, 0  ;;  %vm850_vm15 = vcmp.eq.s32.totalorder %v1690_v15, 7 }
 0x407   : > { %783 = vmatpush.bf16.msrb.mxu3 %v1142_v29  ;;  %v861_v25 = vperm.slane %v857_v16, 0  ;;  %v879_v29 = vperm.slane %v875_v21, 2  ;;  %v991_v21 = vperm.slane %v1593_v17, 5 }
 0x478   : > { %v724_v30 = vpop.xlane.xlu2 %723 }
 0x479   : > { %v725_v31 = vmul.f32 %v724_v30, %v1587_v11  ;;  %v1205_v30 = vld [vmem:[%s1770_s11 + $0x8] sm:$0xff] }
 0x47a   : > { %984 = vmatpush.bf16.msrb.mxu1 %v1205_v30 }
 0x47b   : > { %v726_v32 = vadd.f32 1e-06, %v725_v31 }
 0x47d   : > { %1286 = vrsqrt.f32 %v726_v32  ;;  %vm733_vm8 = vweird.f32 %v726_v32 }
 0x483   : > { %v1287_v33 = vpop.eup %1286 }
 0x484   : > { %v728_v34 = vmul.f32 %v1287_v33, %v726_v32  ;;  %vm734_vm7 = vweird.f32 %v1287_v33 }
 0x485   : > { %vm735_vm9 = vmor %vm733_vm8, %vm734_vm7 }
 0x486   : > { %v729_v35 = vmul.f32 %v1287_v33, %v728_v34  ;;  %v884_v34 = vld [vmem:[%s1769_s10] sm:$0x3] }
 0x488   : > { %v730_v36 = vmul.f32 0.5, %v729_v35 }
 0x48a   : > { %v731_v37 = vsub.f32 1.5, %v730_v36 }
 0x48c   : > { %v732_v38 = vmul.f32 %v1287_v33, %v731_v37 }
 0x48e   : > { %v736_v40 = vsel %vm735_vm9, %v1287_v33, %v732_v38 }
 0x48f   : > { %v737_v41 = vmul.f32 %v736_v40, %v1625_v13  ;;  %v887_v40 = vperm.slane %v884_v34, 1 }
 0x491   : > { %v739_v43 = vmul.f32 %v738_v39, %v737_v41  ;;  %v1204_v39 = vld [vmem:[%s1770_s11] sm:$0xff] }
 0x492   : > { %985 = vmatpush.bf16.msrb.mxu1 %v1204_v39 }
 0x493   : > { %v741_v11 = vadd.f32 %v740_v42, %v739_v43 }
 0x495   : > { %v742_v44 = vpack.c.bf16 %v741_v11, %v741_v11 }
 0x497   : > { %1155 = vmatmul.msk.bf16.vlgmr.msrb.gmra.mxu3 %vm468_vm0, %v742_v44  ;;  %1156 = vmatmul.msk.bf16.vlgmr.msrb.gmra.mxu0 %vm468_vm0, %v742_v44 }
 0x514   : > { %v798_v47 = vpop.f32.mrf.mxu0 }
 0x515   : > { %v799_v48 = vadd.f32 %v798_v47, %v750_v46 }
 0x517   : > { %v1158_v20 = vmul.f32 -1.442695, %v799_v48 }
 0x519   : > { %1288 = vpow2.f32 %v1158_v20 }
 0x51a   : > { %v785_v50 = vpop.f32.mrf.mxu3 }
 0x51b   : > { %v1663_v51 = vadd.f32 %v785_v50, %v749_v49  ;;  %v856_v50 = vperm.slane %v1684_v7, 0 }
 0x51c   : > { %v800_v52 = vpop.f32.mrf.mxu0 }
 0x51d   : > { %v1157_v53 = vmul.f32 -1.442695, %v1663_v51 }
 0x51f   : > { %v1289_v54 = vpop.eup %1288  ;;  %1290 = vpow2.f32 %v1157_v53 }
 0x520   : > { %v809_v55 = vadd.f32 1.0, %v1289_v54  ;;  %v864_v54 = vperm.slane %v1684_v7, 1  ;;  %v886_v7 = vperm.slane %v884_v34, 0 }
 0x522   : > { %1292 = vrcp.f32 %v809_v55  ;;  %v787_v57 = vpop.f32.mrf.mxu3  ;;  %v836_v3 = vand.u32 2147483648, %v809_v55  ;;  %v834_v6 = vand.u32 2147483647, %v809_v55  ;;  %vm830_vm11 = vweird.f32 %v809_v55 }
 0x523   : > { %v868_v57 = vperm.slane %v864_v54, 1 }
 0x524   : > { %v837_v14 = vor.u32 1.1754944e-38, %v836_v3  ;;  %vm835_vm13 = vcmp.eq.f32.partialorder %v834_v6, 8.507059e+37 }
 0x525   : > { %v1291_v59 = vpop.eup %1290 }
 0x526   : > { %v1672_v60 = vadd.f32 1.0, %v1291_v59 }
 0x528   : > { %v1293_v62 = vpop.eup %1292  ;;  %1294 = vrcp.f32 %v1672_v60  ;;  %v821_v42 = vand.u32 2147483648, %v1672_v60  ;;  %vm815_vm2 = vweird.f32 %v1672_v60  ;;  %v819_v11 = vand.u32 2147483647, %v1672_v60 }
 0x529   : > { %v826_v63 = vmul.f32 %v1293_v62, %v809_v55  ;;  %vm831_vm10 = vweird.f32 %v1293_v62  ;;  %v860_v55 = vperm.slane %v856_v50, 0 }
 0x52a   : > { %vm832_vm12 = vmor %vm830_vm11, %vm831_vm10  ;;  %v822_v46 = vor.u32 1.1754944e-38, %v821_v42  ;;  %vm820_vm4 = vcmp.eq.f32.partialorder %v819_v11, 8.507059e+37 }
 0x52b   : > { %v827_v2 = vsub.f32 1.0, %v826_v63 }
 0x52d   : > { %v828_v5 = vmul.f32 %v1293_v62, %v827_v2 }
 0x52e   : > { %v1295_v8 = vpop.eup %1294 }
 0x52f   : > { %v829_v10 = vadd.f32 %v1293_v62, %v828_v5  ;;  %v811_v12 = vmul.f32 %v1295_v8, %v1672_v60  ;;  %vm816_vm1 = vweird.f32 %v1295_v8 }
 0x530   : > { %vm817_vm3 = vmor %vm815_vm2, %vm816_vm1 }
 0x531   : > { %v833_v19 = vsel %vm832_vm12, %v1293_v62, %v829_v10  ;;  %v812_v24 = vsub.f32 1.0, %v811_v12 }
 0x532   : > { %v838_v0 = vsel %vm835_vm13, %v837_v14, %v833_v19 }
 0x533   : > { %v841_v23 = vmul.f32 %v838_v0, %v799_v48  ;;  %v813_v33 = vmul.f32 %v1295_v8, %v812_v24 }
 0x535   : > { %v847_v27 = vrot.slane %v841_v23, 7  ;;  %v852_v28 = vrot.slane %v841_v23, 1  ;;  %v871_v36 = vmul.f32 %v869_v26, %v841_v23  ;;  %v814_v41 = vadd.f32 %v1295_v8, %v813_v33 }
 0x537   : > { %v849_v31 = vsel %vm845_vm14, 0.0, %v847_v27  ;;  %v854_v32 = vsel %vm850_vm15, 0.0, %v852_v28  ;;  %v818_v45 = vsel %vm817_vm3, %v1295_v8, %v814_v41 }
 0x538   : > { %v863_v35 = vmul.f32 %v861_v25, %v849_v31  ;;  %v881_v38 = vmul.f32 %v879_v29, %v854_v32  ;;  %v823_v48 = vsel %vm820_vm4, %v822_v46, %v818_v45 }
 0x539   : > { %v840_v20 = vmul.f32 %v823_v48, %v1663_v51  ;;  %v878_v51 = vperm.slane %v874_v58, 2 }
 0x53a   : > { %v873_v37 = vadd.f32 %v871_v36, %v863_v35 }
 0x53b   : > { %v846_v52 = vrot.slane %v840_v20, 7  ;;  %v851_v59 = vrot.slane %v840_v20, 1  ;;  %v870_v62 = vmul.f32 %v868_v57, %v840_v20 }
 0x53c   : > { %v883_v43 = vadd.f32 %v881_v38, %v873_v37 }
 0x53d   : > { %v848_v56 = vsel %vm845_vm14, 0.0, %v846_v52  ;;  %v853_v1 = vsel %vm850_vm15, 0.0, %v851_v59 }
 0x53e   : > { %v891_v44 = vadd.f32 %v887_v40, %v883_v43  ;;  %v862_v60 = vmul.f32 %v860_v55, %v848_v56  ;;  %v880_v5 = vmul.f32 %v878_v51, %v853_v1 }
 0x540   : > { %v1159_v47 = vmul.f32 -1.442695, %v891_v44  ;;  %v872_v2 = vadd.f32 %v870_v62, %v862_v60 }
 0x542   : > { %1296 = vpow2.f32 %v1159_v47  ;;  %v882_v9 = vadd.f32 %v880_v5, %v872_v2 }
 0x544   : > { %v890_v15 = vadd.f32 %v886_v7, %v882_v9 }
 0x548   : > { %v1297_v49 = vpop.eup %1296 }
 0x549   : > { %v895_v53 = vadd.f32 1.0, %v1297_v49 }
 0x54b   : > { %1298 = vrcp.f32 %v895_v53  ;;  %v907_v4 = vand.u32 2147483648, %v895_v53  ;;  %v905_v8 = vand.u32 2147483647, %v895_v53  ;;  %vm901_vm6 = vweird.f32 %v895_v53 }
 0x54d   : > { %v908_v12 = vor.u32 1.1754944e-38, %v907_v4  ;;  %vm906_vm8 = vcmp.eq.f32.partialorder %v905_v8, 8.507059e+37 }
 0x551   : > { %v1299_v61 = vpop.eup %1298 }
 0x552   : > { %v897_v63 = vmul.f32 %v1299_v61, %v895_v53  ;;  %vm902_vm5 = vweird.f32 %v1299_v61 }
 0x553   : > { %vm903_vm7 = vmor %vm901_vm6, %vm902_vm5 }
 0x554   : > { %v898_v3 = vsub.f32 1.0, %v897_v63 }
 0x556   : > { %v899_v6 = vmul.f32 %v1299_v61, %v898_v3 }
 0x558   : > { %v900_v10 = vadd.f32 %v1299_v61, %v899_v6 }
 0x55a   : > { %v904_v14 = vsel %vm903_vm7, %v1299_v61, %v900_v10 }
 0x55b   : > { %v909_v16 = vsel %vm906_vm8, %v908_v12, %v904_v14 }
 0x55c   : > { %v911_v18 = vmul.f32 %v909_v16, %v891_v44 }
 0x55e   : > { %v912_v19 = vmul.f32 %v911_v18, %v890_v15 }
 0x560   : > { %v913_v0 = vpack.c.bf16 %v912_v19, %v912_v19 }
 0x562   : > { %986 = vmatmul.bf16.vlgmr.msrb.gmra.mxu1 %v913_v0 }
 0x5df   : > { %v987_v22 = vpop.f32.mrf.mxu1 }
 0x5e0   : > { %v992_v23 = vmul.f32 %v991_v21, %v987_v22 }
 0x5e2   : > { %v993_v24 = vadd.f32 %v992_v23, %v1625_v13 }
 0x5e4   : > { %994 = vst.msk [vmem:[%s451_s19] sm:$0xff] %vm468_vm0, %v993_v24 }
 0x5e5   : > { %1387 = shalt.err (!%p1384_p8)
}
 0x5e6   : > { %1220 = dma.vmem_to_hbm [thread:$0]  (%p1542_p5), %s1009_s20, 128, %s1011_s26, %s996_s28  }
 0x5e7   : > { %v989_v17 = vpop.f32.mrf.mxu1 }
 0x5e8 PF: > { %p1237_p9 = scmp.ge.s32.totalorder %s1430_s24, 2  ;;  %s1022_s27 = sand.u32 1, %s1418_s21  }
 0x5e9   : > { %s1023_s18 = scalar_lea.sflag [#allocation4], %s1022_s27 }
 0x5ea   : > { %p1230_p10 = pnand %p1237_p9, %p1546_p6 }
 0x5ec   : > { %p1231_p11 = pneg %p1230_p10 }
 0x5ee   : > { %1413 = dma.done.wait (%p1231_p11), %s1023_s18, 128  }
 0x5ef   : > { %1415 = vsyncadd (%p1231_p11), %s1023_s18, 4294967168  ;;  %s1781_s24 = sld [smem:[#allocation12_spill]]  ;;  %s1784_s21 = smov %s1422_s22 }
 0x5f0   : > { %s1782_s19 = sld [smem:[#allocation11_spill]] }
 0x5f1   : > { %s1783_s23 = sld [smem:[#allocation13_spill]] }
 0x5f5   : > { %p24_p12 = scmp.ge.s32.totalorder %s1781_s24, 4  }
 0x5f6   : > { %s1785_s22 = smov %s1782_s19 }
 0x5f7   :  { %26 = sbr.rel (!%p24_p12) target bundleno = 5 (0x5), region = 115 }
 0x5fc   :  { %1029 = vsyncpa [#allocation3], 1 }
 0x5fd   :  { %1031 = vsyncpa [#allocation3 + $0x1], 1 }
 0x5fe   :  { %1032 = vsyncpa [#allocation6], 1 }
 0x5ff   :  { %1033 = vsyncpa [#allocation4], 1 }
 0x600   :  { %1035 = vsyncpa [#allocation4 + $0x1], 1 }

</bundles_post_ra>
